<compile_context>
chip_gen: v6e
topology: v6e:2x2x1
jax: 0.10.0
libtpu: 0.0.40
codegen_flags: <defaults>
</compile_context>

<pallas_src>
import functools

import jax
import jax.numpy as jnp
from jax.experimental import pallas as pl
from jax.experimental.pallas import tpu as pltpu


def _round_up(x, m):
    return ((x + m - 1) // m) * m


def _make_kernel(need_lce, need_gce, need_pd):
    """Kernel over one lane-tile of the batch (grid axis 0).

    All arrays are lane-major: logits (C, tile_n), features (D, tile_n),
    labels (1, tile_n); outputs are lane-dense (1, tile_n) rows.
    """

    def kernel(*refs):
        refs = list(refs)
        local_ref  = refs.pop(0) if need_lce else None
        global_ref = refs.pop(0) if need_gce else None
        labels_ref = refs.pop(0)
        s_ref      = refs.pop(0) if need_pd else None
        sg_ref     = refs.pop(0) if need_pd else None
        lce_ref    = refs.pop(0) if need_lce else None
        gce_ref    = refs.pop(0) if need_gce else None
        pd_ref     = refs.pop(0) if need_pd else None

        # ---- per-row cross-entropy: logsumexp(x) - x[label], batch on lanes ----
        if need_lce or need_gce:
            labels = labels_ref[...]                                    # (1, t) int32
            c = (local_ref if need_lce else global_ref).shape[0]
            t = labels.shape[1]
            cls = jax.lax.broadcasted_iota(jnp.int32, (c, t), 0)        # class ids
            pick = cls == labels                                        # (c, t) bool

            def per_row_ce(logits_ref):
                x = logits_ref[...].astype(jnp.float32)                 # (c, t)
                m = jnp.max(x, axis=0, keepdims=True)                   # sublane reduce
                lse = m + jnp.log(jnp.sum(jnp.exp(x - m), axis=0, keepdims=True))
                picked = jnp.sum(jnp.where(pick, x, 0.0), axis=0, keepdims=True)
                return lse - picked                                     # (1, t)

            if need_lce:
                lce_ref[...] = per_row_ce(local_ref)
            if need_gce:
                gce_ref[...] = per_row_ce(global_ref)

        # ---- per-row pairwise distance || s - s_global + eps ||_2 ----
        if need_pd:
            d = s_ref[...].astype(jnp.float32) - sg_ref[...].astype(jnp.float32) + 1e-6
            pd_ref[...] = jnp.sqrt(jnp.sum(d * d, axis=0, keepdims=True))

    return kernel


def _vmem_plan():
    """(working-set budget, min grid tiles, scoped vmem limit) per generation."""
    try:
        cap = int(pltpu.get_tpu_info().vmem_capacity_bytes)
    except Exception:
        cap = 64 << 20                      # be conservative (v7x-like) if unknown
    if cap <= (64 << 20):                   # v7x: 64 MiB per TensorCore, 2 TCs
        return 14 << 20, 2, 32 << 20
    return 40 << 20, 1, 64 << 20            # v5e / v6e: 128 MiB physical VMEM


def _choose_tile(n, c, d, itemsize, need_lce, need_gce, need_pd, budget, min_tiles):
    """Largest lane-tile (multiple of 128, or the full batch) fitting the budget."""
    n_ce = int(need_lce) + int(need_gce)
    c_pad = _round_up(max(c, 1), 8) if n_ce else 0
    d_pad = _round_up(max(d, 1), 8) if need_pd else 0

    per_row = 2 * 4                               # labels (int32), double-buffered
    per_row += 2 * n_ce * c_pad * itemsize        # logits, double-buffered
    per_row += 2 * n_ce * 4                       # CE outputs (f32), double-buffered
    per_row += 3 * n_ce * c_pad * 4               # f32 temporaries for the CE math
    if need_pd:
        per_row += 2 * 2 * d_pad * itemsize       # s, s_global, double-buffered
        per_row += 2 * 4                          # pd output
        per_row += 2 * d_pad * 4                  # f32 temporaries

    tile = 8192
    while tile > 128 and tile * per_row > budget:
        tile //= 2
    # Keep >= min_tiles grid steps so both v7x TensorCores get work.
    while tile > 128 and -(-n // tile) < min_tiles:
        tile //= 2
    if n <= tile:
        return n                                  # single full-extent tile
    return tile                                   # multiple of 128


def _run_loss_kernel(flag_i, local_t, global_t, labels2, s_t, sg_t, row_tile):
    need_lce = flag_i in (1, 2)
    need_gce = flag_i in (2, 3)
    need_pd = flag_i == 1

    n = labels2.shape[1]
    c = local_t.shape[0] if need_lce else (global_t.shape[0] if need_gce else 0)
    d = s_t.shape[0] if need_pd else 0
    big = local_t if need_lce else (global_t if need_gce else s_t)
    itemsize = big.dtype.itemsize

    budget, min_tiles, vmem_limit = _vmem_plan()
    if row_tile is not None:
        tile = n if row_tile >= n else row_tile
    else:
        tile = _choose_tile(n, c, d, itemsize, need_lce, need_gce, need_pd,
                            budget, min_tiles)
    num_tiles = pl.cdiv(n, tile)

    def lane_spec(rows):
        return pl.BlockSpec((rows, tile), lambda i: (0, i))

    inputs, in_specs = [], []
    if need_lce:
        inputs.append(local_t)
        in_specs.append(lane_spec(c))
    if need_gce:
        inputs.append(global_t)
        in_specs.append(lane_spec(c))
    inputs.append(labels2)
    in_specs.append(lane_spec(1))
    if need_pd:
        inputs.append(s_t)
        in_specs.append(lane_spec(d))
        inputs.append(sg_t)
        in_specs.append(lane_spec(d))

    n_outs = int(need_lce) + int(need_gce) + int(need_pd)
    out_shapes = tuple(jax.ShapeDtypeStruct((1, n), jnp.float32) for _ in range(n_outs))
    out_specs = tuple(lane_spec(1) for _ in range(n_outs))

    # Advisory cost hint for XLA scheduling (inputs + outputs).
    flops = transcendentals = 0
    bytes_accessed = n * 4                            # labels (int32)
    if need_lce:
        flops += 5 * n * c
        transcendentals += n * (c + 1)
        bytes_accessed += n * c * itemsize + n * 4
    if need_gce:
        flops += 5 * n * c
        transcendentals += n * (c + 1)
        bytes_accessed += n * c * itemsize + n * 4
    if need_pd:
        flops += 4 * n * d
        transcendentals += n
        bytes_accessed += 2 * n * d * itemsize + n * 4

    kernel = _make_kernel(need_lce, need_gce, need_pd)

    return pl.pallas_call(
        kernel,
        out_shape=out_shapes,
        grid=(num_tiles,),
        in_specs=in_specs,
        out_specs=out_specs,
        compiler_params=pltpu.CompilerParams(
            dimension_semantics=("parallel",),        # v7x: shard tiles over both TCs
            vmem_limit_bytes=int(vmem_limit)),
        cost_estimate=pl.CostEstimate(
            flops=int(flops),
            transcendentals=int(transcendentals),
            bytes_accessed=int(bytes_accessed)),
    )(*inputs)


@functools.partial(jax.jit, static_argnames=("flag_i", "row_tile"))
def _global_loss_jit(s, s_global, local_score, global_score, y_true, gama,
                     flag_i, row_tile=None):
    n = y_true.shape[0]
    labels2 = y_true.astype(jnp.int32).reshape(1, n)

    need_lce = flag_i in (1, 2)
    need_gce = flag_i in (2, 3)
    need_pd = flag_i == 1

    # Lane-major layouts: batch on the 128-lane axis (layout plumbing only).
    local_t  = local_score.T if need_lce else None
    global_t = global_score.T if need_gce else None
    s_t      = s.T if need_pd else None
    sg_t     = s_global.T if need_pd else None

    outs = _run_loss_kernel(flag_i, local_t, global_t, labels2, s_t, sg_t, row_tile)

    o = 0
    loss1 = loss2 = loss3 = None
    if need_lce:
        loss1 = jnp.sum(outs[o][0]) / n            # mean CE (local), reduction='mean'
        o += 1
    if need_gce:
        loss3 = jnp.sum(outs[o][0]) / n            # mean CE (global)
        o += 1
    if need_pd:
        loss2 = outs[o][0]                         # (N,) like torch.pairwise_distance
        o += 1

    if flag_i == 1:
        return (1.0 - gama) * loss1 + gama * loss2  # length-N vector, as in PyTorch
    if flag_i == 2:
        return loss1 + gama * loss3
    return loss3


def global_loss(s, s_global, local_score, global_score, y_true, gama, flag, row_tile=None):
    """Mirrors GlobalLossFunc.forward; `flag` is a string like 'a:b:2'."""
    flag_i = int(flag.split(':')[2])
    if flag_i not in (1, 2, 3):
        raise ValueError(f"unsupported flag value {flag_i}")
    return _global_loss_jit(s, s_global, local_score, global_score, y_true,
                            gama, flag_i=flag_i, row_tile=row_tile)


if __name__ == "__main__":
    # pure-JAX reference
    def ref_ce(logits, labels):
        x = logits.astype(jnp.float32)
        lse = jax.scipy.special.logsumexp(x, axis=-1)
        picked = jnp.take_along_axis(x, labels[:, None], axis=-1)[:, 0]
        return jnp.mean(lse - picked)

    def ref_loss(s_, sg_, ls_, gs_, y_, gama, flag_i):
        l1 = ref_ce(ls_, y_)
        l3 = ref_ce(gs_, y_)
        diff = s_.astype(jnp.float32) - sg_.astype(jnp.float32) + 1e-6
        l2 = jnp.sqrt(jnp.sum(diff * diff, axis=-1))
        if flag_i == 1:
            return (1.0 - gama) * l1 + gama * l2
        if flag_i == 2:
            return l1 + gama * l3
        return l3

    GAMA = 0.3
    C, D = 10, 32

    # --- f32 inputs, small batch (single full-extent tile), all three flags ---
    key = jax.random.PRNGKey(0)
    k1, k2, k3, k4, k5 = jax.random.split(key, 5)
    N = 8
    s            = jax.random.normal(k1, (N, D), dtype=jnp.float32)
    s_global     = jax.random.normal(k2, (N, D), dtype=jnp.float32)
    local_score  = jax.random.normal(k3, (N, C), dtype=jnp.float32)
    global_score = jax.random.normal(k4, (N, C), dtype=jnp.float32)
    y_true       = jax.random.randint(k5, (N,), 0, C, dtype=jnp.int32)

    for flag_i in (1, 2, 3):
        out = global_loss(s, s_global, local_score, global_score, y_true,
                          GAMA, f"m:n:{flag_i}")
        out = jax.block_until_ready(out)
        ref = ref_loss(s, s_global, local_score, global_score, y_true, GAMA, flag_i)
        assert jnp.allclose(out, ref, rtol=1e-5, atol=1e-5), (flag_i, out, ref)

    # --- bf16 inputs, multi-tile grid with a ragged last tile ---
    # N=300 with 128-lane tiles -> 3 grid steps, last tile only 44 rows valid.
    N2 = 300
    j1, j2, j3, j4, j5 = jax.random.split(jax.random.PRNGKey(1), 5)
    s2  = jax.random.normal(j1, (N2, D), dtype=jnp.bfloat16)
    sg2 = jax.random.normal(j2, (N2, D), dtype=jnp.bfloat16)
    ls2 = jax.random.normal(j3, (N2, C), dtype=jnp.bfloat16)
    gs2 = jax.random.normal(j4, (N2, C), dtype=jnp.bfloat16)
    y2  = jax.random.randint(j5, (N2,), 0, C, dtype=jnp.int32)
    for flag_i in (1, 2, 3):
        out = global_loss(s2, sg2, ls2, gs2, y2, GAMA, f"m:n:{flag_i}", row_tile=128)
        out = jax.block_until_ready(out)
        ref = ref_loss(s2, sg2, ls2, gs2, y2, GAMA, flag_i)
        assert jnp.allclose(out, ref, rtol=2e-2, atol=2e-2), (flag_i, out, ref)

    # TODO(synk): if C ever reaches vocab scale (>~1k), add a C-tiled online logsumexp.
    print("KERNEL_OK")
</pallas_src>

<mosaic_0001>
module attributes {stable_mosaic.version = 11 : i64} {
  func.func @kernel(%arg0: i32, %arg1: memref<10x8xf32, #tpu.memory_space<vmem>>, %arg2: memref<1x8xi32, #tpu.memory_space<vmem>>, %arg3: memref<32x8xf32, #tpu.memory_space<vmem>>, %arg4: memref<32x8xf32, #tpu.memory_space<vmem>>, %arg5: memref<1x8xf32, #tpu.memory_space<vmem>>, %arg6: memref<1x8xf32, #tpu.memory_space<vmem>>) attributes {dimension_semantics = [#tpu.dimension_semantics<parallel>], iteration_bounds = array<i64: 1>, scalar_prefetch = 0 : i64, scratch_operands = 0 : i64, tpu.core_type = #tpu.core_type<tc>, window_params = [{transform_indices = @transform_0, window_bounds = array<i64: 10, 8>}, {transform_indices = @transform_1, window_bounds = array<i64: 1, 8>}, {transform_indices = @transform_2, window_bounds = array<i64: 32, 8>}, {transform_indices = @transform_3, window_bounds = array<i64: 32, 8>}, {transform_indices = @transform_4, window_bounds = array<i64: 1, 8>}, {transform_indices = @transform_5, window_bounds = array<i64: 1, 8>}]} {
    %c0 = arith.constant 0 : index
    %c0_0 = arith.constant 0 : index
    %0 = vector.load %arg2[%c0, %c0_0] : memref<1x8xi32, #tpu.memory_space<vmem>>, vector<1x8xi32>
    %1 = tpu.iota {dimensions = array<i32: 0>} : vector<10x8xi32>
    %2 = vector.broadcast %0 : vector<1x8xi32> to vector<10x8xi32>
    %3 = arith.cmpi eq, %1, %2 : vector<10x8xi32>
    %c0_1 = arith.constant 0 : index
    %c0_2 = arith.constant 0 : index
    %4 = vector.load %arg1[%c0_1, %c0_2] : memref<10x8xf32, #tpu.memory_space<vmem>>, vector<10x8xf32>
    %cst = arith.constant dense<0xFF800000> : vector<8xf32>
    %5 = vector.multi_reduction <maximumf>, %4, %cst [0] : vector<10x8xf32> to vector<8xf32>
    %6 = vector.shape_cast %5 : vector<8xf32> to vector<1x8xf32>
    %7 = vector.broadcast %6 : vector<1x8xf32> to vector<10x8xf32>
    %8 = arith.subf %4, %7 : vector<10x8xf32>
    %9 = math.exp %8 : vector<10x8xf32>
    %cst_3 = arith.constant dense<0.000000e+00> : vector<8xf32>
    %10 = vector.multi_reduction <add>, %9, %cst_3 [0] : vector<10x8xf32> to vector<8xf32>
    %11 = vector.shape_cast %10 : vector<8xf32> to vector<1x8xf32>
    %12 = math.log %11 : vector<1x8xf32>
    %13 = arith.addf %6, %12 : vector<1x8xf32>
    %cst_4 = arith.constant 0.000000e+00 : f32
    %14 = vector.broadcast %cst_4 : f32 to vector<10x8xf32>
    %15 = arith.select %3, %4, %14 : vector<10x8xi1>, vector<10x8xf32>
    %cst_5 = arith.constant dense<0.000000e+00> : vector<8xf32>
    %16 = vector.multi_reduction <add>, %15, %cst_5 [0] : vector<10x8xf32> to vector<8xf32>
    %17 = vector.shape_cast %16 : vector<8xf32> to vector<1x8xf32>
    %18 = arith.subf %13, %17 : vector<1x8xf32>
    %c0_6 = arith.constant 0 : index
    %c0_7 = arith.constant 0 : index
    %19 = vector.load %arg5[%c0_6, %c0_7] : memref<1x8xf32, #tpu.memory_space<vmem>>, vector<1x8xf32>
    tpu.vector_store %arg5[%c0_6, %c0_7], %18 {strides = array<i32>} : memref<1x8xf32, #tpu.memory_space<vmem>>, vector<1x8xf32>,
    %c0_8 = arith.constant 0 : index
    %c0_9 = arith.constant 0 : index
    %20 = vector.load %arg3[%c0_8, %c0_9] : memref<32x8xf32, #tpu.memory_space<vmem>>, vector<32x8xf32>
    %c0_10 = arith.constant 0 : index
    %c0_11 = arith.constant 0 : index
    %21 = vector.load %arg4[%c0_10, %c0_11] : memref<32x8xf32, #tpu.memory_space<vmem>>, vector<32x8xf32>
    %22 = arith.subf %20, %21 : vector<32x8xf32>
    %cst_12 = arith.constant 9.99999997E-7 : f32
    %23 = vector.broadcast %cst_12 : f32 to vector<32x8xf32>
    %24 = arith.addf %22, %23 : vector<32x8xf32>
    %25 = arith.mulf %24, %24 : vector<32x8xf32>
    %cst_13 = arith.constant dense<0.000000e+00> : vector<8xf32>
    %26 = vector.multi_reduction <add>, %25, %cst_13 [0] : vector<32x8xf32> to vector<8xf32>
    %27 = vector.shape_cast %26 : vector<8xf32> to vector<1x8xf32>
    %28 = math.sqrt %27 : vector<1x8xf32>
    %c0_14 = arith.constant 0 : index
    %c0_15 = arith.constant 0 : index
    %29 = vector.load %arg6[%c0_14, %c0_15] : memref<1x8xf32, #tpu.memory_space<vmem>>, vector<1x8xf32>
    tpu.vector_store %arg6[%c0_14, %c0_15], %28 {strides = array<i32>} : memref<1x8xf32, #tpu.memory_space<vmem>>, vector<1x8xf32>,
    return
  }
  func.func @transform_0(%arg0: i32) -> (i32, i32) {
    %c0_i32 = arith.constant 0 : i32
    %c0_i32_0 = arith.constant 0 : i32
    return %c0_i32, %arg0 : i32, i32
  }
  func.func @transform_1(%arg0: i32) -> (i32, i32) {
    %c0_i32 = arith.constant 0 : i32
    %c0_i32_0 = arith.constant 0 : i32
    return %c0_i32, %arg0 : i32, i32
  }
  func.func @transform_2(%arg0: i32) -> (i32, i32) {
    %c0_i32 = arith.constant 0 : i32
    %c0_i32_0 = arith.constant 0 : i32
    return %c0_i32, %arg0 : i32, i32
  }
  func.func @transform_3(%arg0: i32) -> (i32, i32) {
    %c0_i32 = arith.constant 0 : i32
    %c0_i32_0 = arith.constant 0 : i32
    return %c0_i32, %arg0 : i32, i32
  }
  func.func @transform_4(%arg0: i32) -> (i32, i32) {
    %c0_i32 = arith.constant 0 : i32
    %c0_i32_0 = arith.constant 0 : i32
    return %c0_i32, %arg0 : i32, i32
  }
  func.func @transform_5(%arg0: i32) -> (i32, i32) {
    %c0_i32 = arith.constant 0 : i32
    %c0_i32_0 = arith.constant 0 : i32
    return %c0_i32, %arg0 : i32, i32
  }
}

</mosaic_0001>

<bundles_post_ra>
// kernel: _global_loss_jit.1
= control target key start
LH: loop header
LB: loop body
LE: loop exit
PB: predicated region body
PF: predicated region fallthrough
CT: control target
= control target key end

     0   :  { %vm31_vm0 = vcmask 64512   ;;  %vm33_vm1 = vcmask 58368   ;;  %v20_v44 = vlaneseq  ;;  %vm72_vm6 = vcmask 57344   ;;  %s213_s0 = inlined_call_operand.vmem [shape: f32[10,8], index: 0, kind: input, shape index: {}]   ;;  %s214_s2 = inlined_call_operand.vmem [shape: f32[32,8], index: 2, kind: input, shape index: {}]   ;;  %s215_s3 = inlined_call_operand.vmem [shape: f32[32,8], index: 3, kind: input, shape index: {}]   ;;  %s216_s1 = inlined_call_operand.vmem [shape: s32[1,8], index: 1, kind: input, shape index: {}]   ;;  %s217_s5 = inlined_call_operand.vmem [shape: f32[1,8], index: 5, kind: output, shape index: {1}]   ;;  %s218_s4 = inlined_call_operand.vmem [shape: f32[1,8], index: 4, kind: output, shape index: {0}]  }
   0x1   :  { %v29_v0 = vld [vmem:[%s213_s0] sm:$0xff]  ;;  %v30_v1 = vld [vmem:[%s213_s0 + $0x8] sm:$0x3]  ;;  %v76_v6 = vld [vmem:[%s214_s2 + $0x10] sm:$0xff] }
   0x2   :  { %v32_v2 = vsel %vm31_vm0, %v29_v0, -inf  ;;  %v34_v3 = vsel %vm33_vm1, %v30_v1, -inf  ;;  %v74_v4 = vld [vmem:[%s214_s2] sm:$0xff]  ;;  %v75_v5 = vld [vmem:[%s214_s2 + $0x8] sm:$0xff]  ;;  %v77_v8 = vld [vmem:[%s214_s2 + $0x18] sm:$0xff]  ;;  %v21_v47 = vshrl.u32 %v20_v44, 7 }
   0x3   :  { %v35_v7 = vmax.f32 %v32_v2, %v34_v3  ;;  %v78_v9 = vld [vmem:[%s215_s3] sm:$0xff]  ;;  %v79_v10 = vld [vmem:[%s215_s3 + $0x8] sm:$0xff]  ;;  %v80_v11 = vld [vmem:[%s215_s3 + $0x10] sm:$0xff] }
   0x4   :  { %v81_v12 = vld [vmem:[%s215_s3 + $0x18] sm:$0xff]  ;;  %v82_v13 = vsub.f32 %v74_v4, %v78_v9  ;;  %v83_v14 = vsub.f32 %v75_v5, %v79_v10  ;;  %v84_v16 = vsub.f32 %v76_v6, %v80_v11  ;;  %v22_v50 = vadd.s32 8, %v21_v47  ;;  %v123_v51 = vld [vmem:[%s216_s1] ss:$0 sm:$0xff] }
   0x5   :  { %v36_v15 = vrot.slane %v35_v7, 4  ;;  %v85_v17 = vsub.f32 %v77_v8, %v81_v12  ;;  %vm27_vm2 = vcmp.eq.s32.totalorder %v21_v47, %v123_v51 }
   0x6   :  { %v86_v18 = vadd.f32 1e-06, %v82_v13  ;;  %v87_v19 = vadd.f32 1e-06, %v83_v14  ;;  %v88_v21 = vadd.f32 1e-06, %v84_v16  ;;  %vm28_vm3 = vcmp.eq.s32.totalorder %v22_v50, %v123_v51 }
   0x7   :  { %v37_v20 = vmax.f32 %v35_v7, %v36_v15  ;;  %v89_v22 = vadd.f32 1e-06, %v85_v17  ;;  %v60_v55 = vsel %vm27_vm2, %v29_v0, 0.0  ;;  %v61_v56 = vsel %vm28_vm3, %v30_v1, 0.0 }
   0x8   :  { %v90_v23 = vmul.f32 %v86_v18, %v86_v18  ;;  %v91_v24 = vmul.f32 %v87_v19, %v87_v19  ;;  %v92_v26 = vmul.f32 %v88_v21, %v88_v21  ;;  %v62_v59 = vsel %vm31_vm0, %v60_v55, 0.0 }
   0x9   :  { %v38_v25 = vrot.slane %v37_v20, 2  ;;  %v93_v27 = vmul.f32 %v89_v22, %v89_v22  ;;  %v63_v60 = vsel %vm33_vm1, %v61_v56, 0.0 }
   0xa   :  { %v94_v28 = vsel %vm31_vm0, %v90_v23, 0.0  ;;  %v95_v29 = vsel %vm31_vm0, %v91_v24, 0.0  ;;  %v97_v32 = vsel %vm31_vm0, %v92_v26, 0.0  ;;  %v64_v63 = vadd.f32 %v63_v60, %v62_v59 }
   0xb   :  { %v39_v30 = vmax.f32 %v37_v20, %v38_v25  ;;  %v96_v31 = vadd.f32 %v95_v29, %v94_v28  ;;  %v99_v33 = vsel %vm31_vm0, %v93_v27, 0.0 }
   0xd   :  { %v40_v34 = vrot.slane %v39_v30, 1  ;;  %v98_v35 = vadd.f32 %v97_v32, %v96_v31 }
   0xf   :  { %v41_v36 = vmax.f32 %v39_v30, %v40_v34  ;;  %v100_v37 = vadd.f32 %v99_v33, %v98_v35 }
  0x11   :  { %v42_v38 = vsub.f32 %v29_v0, %v41_v36  ;;  %v43_v39 = vsub.f32 %v30_v1, %v41_v36  ;;  %v101_v40 = vrot.slane %v100_v37, 4  ;;  %v65_v0 = vrot.slane %v64_v63, 4 }
  0x13   :  { %v44_v41 = vmul.f32 1.442695, %v42_v38  ;;  %v46_v42 = vmul.f32 1.442695, %v43_v39  ;;  %v102_v43 = vadd.f32 %v101_v40, %v100_v37  ;;  %v66_v10 = vadd.f32 %v65_v0, %v64_v63 }
  0x15   :  { %124 = vpow2.f32 %v44_v41  ;;  %v103_v45 = vrot.slane %v102_v43, 2  ;;  %v67_v11 = vrot.slane %v66_v10, 2 }
  0x16   :  { %126 = vpow2.f32 %v46_v42 }
  0x17   :  { %v104_v46 = vadd.f32 %v103_v45, %v102_v43  ;;  %v68_v12 = vadd.f32 %v67_v11, %v66_v10 }
  0x19   :  { %v105_v48 = vrot.slane %v104_v46, 1  ;;  %v69_v13 = vrot.slane %v68_v12, 1 }
  0x1b   :  { %v106_v49 = vadd.f32 %v105_v48, %v104_v46  ;;  %v70_v16 = vadd.f32 %v69_v13, %v68_v12 }
  0x1d   :  { %128 = vrsqrt.f32 %v106_v49  ;;  %vm109_vm4 = vcmp.eq.f32.partialorder %v106_v49, inf  ;;  %v112_v3 = vand.u32 2147483648, %v106_v49  ;;  %vm111_vm5 = vcmp.eq.f32.partialorder %v106_v49, 0.0 }
  0x22   :  { %v125_v52 = vpop.eup %124 }
  0x23   :  { %v127_v53 = vpop.eup %126  ;;  %v48_v54 = vsel %vm31_vm0, %v125_v52, 0.0 }
  0x24   :  { %v49_v57 = vsel %vm33_vm1, %v127_v53, 0.0 }
  0x25   :  { %v50_v58 = vadd.f32 %v49_v57, %v48_v54 }
  0x27   :  { %v51_v61 = vrot.slane %v50_v58, 4 }
  0x29   :  { %v52_v62 = vadd.f32 %v51_v61, %v50_v58 }
  0x2a   :  { %v129_v2 = vpop.eup %128 }
  0x2b   :  { %v53_v4 = vrot.slane %v52_v62, 2  ;;  %v108_v5 = vmul.f32 %v129_v2, %v106_v49 }
  0x2d   :  { %v54_v6 = vadd.f32 %v53_v4, %v52_v62  ;;  %v110_v1 = vsel %vm109_vm4, %v106_v49, %v108_v5 }
  0x2e   :  { %v113_v7 = vsel %vm111_vm5, %v112_v3, %v110_v1 }
  0x2f   :  { %v55_v8 = vrot.slane %v54_v6, 1  ;;  %114 = vst.msk [vmem:[%s217_s5] sm:$0x1] %vm72_vm6, %v113_v7 }
  0x31   :  { %v56_v9 = vadd.f32 %v55_v8, %v54_v6 }
  0x33   :  { %130 = vlog2.f32 %v56_v9 }
  0x40   :  { %v131_v14 = vpop.eup %130 }
  0x41   :  { %v58_v15 = vmul.f32 0.6931472, %v131_v14 }
  0x43   :  { %v59_v17 = vadd.f32 %v58_v15, %v41_v36 }
  0x45   :  { %v71_v18 = vsub.f32 %v59_v17, %v70_v16 }
  0x47   :  { %73 = vst.msk [vmem:[%s218_s4] sm:$0x1] %vm72_vm6, %v71_v18 }

</bundles_post_ra>
